<compile_context>
chip_gen: v7x
topology: tpu7x:2x2x1
jax: 0.10.0
libtpu: 0.0.40
codegen_flags: <defaults>
</compile_context>

<pallas_src>
import jax
import jax.numpy as jnp
from jax.experimental import pallas as pl
from jax.experimental.pallas import tpu as pltpu  # noqa: F401  (TPU-specific tuning hooks)


_FEAT_SHAPE = (1, 400, 8, 7, 7)   # matches torch.randn(1, 400, 8, 7, 7)
_LANES = 128


# ----------------------------------------------------------------------------
# Pallas kernel: identity backbone (MockModule.forward(x) -> x)
# ----------------------------------------------------------------------------
def _identity_kernel(x_ref, o_ref):
    # Pure pass-through of the single, full-array tile.
    o_ref[...] = x_ref[...]


def backbone_identity(feat: jax.Array) -> jax.Array:
    """Run the identity backbone as a single-step Pallas kernel.

    feat: (N, C, T, H, W) float32, NCTHW layout.
    """
    shape = feat.shape
    total = 1
    for d in shape:
        total *= d

    if total % _LANES == 0:
        # Lane-dense view: (1225, 128) for the reference shape.
        rows, cols = total // _LANES, _LANES
    else:
        # Fallback for odd sizes: keep last dim as-is.
        rows, cols = total // shape[-1], shape[-1]

    x2d = feat.reshape(rows, cols)

    out2d = pl.pallas_call(
        _identity_kernel,
        out_shape=jax.ShapeDtypeStruct((rows, cols), feat.dtype),
        # Empty grid: one kernel invocation, one full-array block per operand.
        in_specs=[pl.BlockSpec((rows, cols), lambda: (0, 0))],
        out_specs=pl.BlockSpec((rows, cols), lambda: (0, 0)),
        # Identity copy: let the output alias (and reuse) the input buffer.
        input_output_aliases={0: 0},
    )(x2d)

    return out2d.reshape(shape)


@jax.jit
def _feat_forward(key: jax.Array) -> jax.Array:
    """torch.randn(1, 400, 8, 7, 7) -> identity backbone, fully jitted."""
    feat = jax.random.normal(key, _FEAT_SHAPE, dtype=jnp.float32)
    return backbone_identity(feat)


# ----------------------------------------------------------------------------
# MockModel equivalent
# ----------------------------------------------------------------------------
class MockModelJAX:
    """JAX/Pallas port of MockModel."""

    def __init__(self, task_type: str, key=None):
        self.task_type = task_type
        self._key = key if key is not None else jax.random.PRNGKey(0)

    def forward(self, return_loss: bool, imgs=None):
        # Backbone pass (identity).  No host sync here: let XLA overlap it
        # with surrounding work; callers block only when they need the value.
        _ = _feat_forward(self._key)

        if self.task_type == "cls":
            return jnp.array([[0, 0, 1]], dtype=jnp.int32)
        # Detection-style constant output.
        return [[
            jnp.array([[0.0, 0.0, 1.0, 1.0, 0.1]], dtype=jnp.float32),
            jnp.array([[0.0, 0.0, 1.0, 1.0, 0.2]], dtype=jnp.float32),
            jnp.array([[0.0, 0.0, 1.0, 1.0, 0.7]], dtype=jnp.float32),
        ]]

    @staticmethod
    def named_parameters():
        # Deterministic synthetic parameter, matching the torch version's shape.
        return {"name": jnp.array([0.5], dtype=jnp.float32)}.items()


if __name__ == "__main__":
    key = jax.random.PRNGKey(0)

    # Sanity check of the Pallas backbone: identity must hold exactly.
    # Compare against an independently recomputed reference (same key ->
    # identical sample) so donation/aliasing of the kernel input is irrelevant.
    feat_ref = jax.random.normal(key, _FEAT_SHAPE, dtype=jnp.float32)
    feat_out = _feat_forward(key)
    jax.block_until_ready(feat_out)
    assert feat_out.shape == _FEAT_SHAPE
    assert jnp.array_equal(feat_ref, feat_out), "identity backbone mismatch"

    # Classification path.
    model_cls = MockModelJAX("cls", key=key)
    cls_out = model_cls.forward(return_loss=False, imgs=None)
    jax.block_until_ready(cls_out)
    assert cls_out.shape == (1, 3)
    assert jnp.array_equal(cls_out, jnp.array([[0, 0, 1]], dtype=jnp.int32))

    # Detection path.
    model_det = MockModelJAX("det", key=key)
    det_out = model_det.forward(return_loss=False, imgs=None)
    jax.block_until_ready(det_out[0][0])
    assert len(det_out) == 1 and len(det_out[0]) == 3
    assert det_out[0][2].shape == (1, 5)

    print("KERNEL_OK")
</pallas_src>

<mosaic_0001>
module attributes {stable_mosaic.version = 11 : i64} {
  func.func @_identity_kernel(%arg0: memref<1225x128xf32, #tpu.memory_space<vmem>>, %arg1: memref<1225x128xf32, #tpu.memory_space<vmem>>) attributes {dimension_semantics = [], scalar_prefetch = 0 : i64, scratch_operands = 0 : i64, tpu.core_type = #tpu.core_type<tc>} {
    %c0 = arith.constant 0 : index
    %c0_0 = arith.constant 0 : index
    %0 = vector.load %arg0[%c0, %c0_0] : memref<1225x128xf32, #tpu.memory_space<vmem>>, vector<1225x128xf32>
    %c0_1 = arith.constant 0 : index
    %c0_2 = arith.constant 0 : index
    %1 = vector.load %arg1[%c0_1, %c0_2] : memref<1225x128xf32, #tpu.memory_space<vmem>>, vector<1225x128xf32>
    tpu.vector_store %arg1[%c0_1, %c0_2], %0 {strides = array<i32>} : memref<1225x128xf32, #tpu.memory_space<vmem>>, vector<1225x128xf32>,
    return
  }
}

</mosaic_0001>

<bundles_post_ra>
// kernel: _feat_forward.1
= control target key start
LH: loop header
LB: loop body
LE: loop exit
PB: predicated region body
PF: predicated region fallthrough
CT: control target
= control target key end

     0   :  { %s1254_s0 = inlined_call_operand.vmem [shape: f32[1225,128], index: 0, kind: input, shape index: {}, may-alias: {0,1}]   ;;  %s1255_s1 = inlined_call_operand.vmem [shape: f32[1225,128], index: 1, kind: output, shape index: {}, may-alias: {0,1}]  }
   0x1   :  { %v8_v0 = vld [vmem:[%s1254_s0] sm:$0xff]  ;;  %v9_v1 = vld [vmem:[%s1254_s0 + $0x8] sm:$0xff]  ;;  %v10_v2 = vld [vmem:[%s1254_s0 + $0x10] sm:$0xff] }
   0x2   :  { %162 = vst [vmem:[%s1255_s1] sm:$0xff] %v8_v0  ;;  %163 = vst [vmem:[%s1255_s1 + $0x8] sm:$0xff] %v9_v1 }
   0x3   :  { %164 = vst [vmem:[%s1255_s1 + $0x10] sm:$0xff] %v10_v2 }
   0xa   :  { %v11_v3 = vld [vmem:[%s1254_s0 + $0x18] sm:$0xff]  ;;  %v12_v4 = vld [vmem:[%s1254_s0 + $0x20] sm:$0xff]  ;;  %v13_v5 = vld [vmem:[%s1254_s0 + $0x28] sm:$0xff] }
   0xb   :  { %165 = vst [vmem:[%s1255_s1 + $0x18] sm:$0xff] %v11_v3  ;;  %166 = vst [vmem:[%s1255_s1 + $0x20] sm:$0xff] %v12_v4 }
   0xc   :  { %167 = vst [vmem:[%s1255_s1 + $0x28] sm:$0xff] %v13_v5 }
  0x13   :  { %v14_v6 = vld [vmem:[%s1254_s0 + $0x30] sm:$0xff]  ;;  %v15_v7 = vld [vmem:[%s1254_s0 + $0x38] sm:$0xff]  ;;  %v16_v8 = vld [vmem:[%s1254_s0 + $0x40] sm:$0xff] }
  0x14   :  { %168 = vst [vmem:[%s1255_s1 + $0x30] sm:$0xff] %v14_v6  ;;  %169 = vst [vmem:[%s1255_s1 + $0x38] sm:$0xff] %v15_v7 }
  0x15   :  { %170 = vst [vmem:[%s1255_s1 + $0x40] sm:$0xff] %v16_v8 }
  0x1c   :  { %v17_v9 = vld [vmem:[%s1254_s0 + $0x48] sm:$0xff]  ;;  %v18_v10 = vld [vmem:[%s1254_s0 + $0x50] sm:$0xff]  ;;  %v19_v11 = vld [vmem:[%s1254_s0 + $0x58] sm:$0xff] }
  0x1d   :  { %171 = vst [vmem:[%s1255_s1 + $0x48] sm:$0xff] %v17_v9  ;;  %172 = vst [vmem:[%s1255_s1 + $0x50] sm:$0xff] %v18_v10 }
  0x1e   :  { %173 = vst [vmem:[%s1255_s1 + $0x58] sm:$0xff] %v19_v11 }
  0x25   :  { %v20_v12 = vld [vmem:[%s1254_s0 + $0x60] sm:$0xff]  ;;  %v21_v13 = vld [vmem:[%s1254_s0 + $0x68] sm:$0xff]  ;;  %v22_v14 = vld [vmem:[%s1254_s0 + $0x70] sm:$0xff] }
  0x26   :  { %174 = vst [vmem:[%s1255_s1 + $0x60] sm:$0xff] %v20_v12  ;;  %175 = vst [vmem:[%s1255_s1 + $0x68] sm:$0xff] %v21_v13 }
  0x27   :  { %176 = vst [vmem:[%s1255_s1 + $0x70] sm:$0xff] %v22_v14 }
  0x2e   :  { %v23_v15 = vld [vmem:[%s1254_s0 + $0x78] sm:$0xff]  ;;  %v24_v16 = vld [vmem:[%s1254_s0 + $0x80] sm:$0xff]  ;;  %v25_v17 = vld [vmem:[%s1254_s0 + $0x88] sm:$0xff] }
  0x2f   :  { %177 = vst [vmem:[%s1255_s1 + $0x78] sm:$0xff] %v23_v15  ;;  %178 = vst [vmem:[%s1255_s1 + $0x80] sm:$0xff] %v24_v16 }
  0x30   :  { %179 = vst [vmem:[%s1255_s1 + $0x88] sm:$0xff] %v25_v17 }
  0x37   :  { %v26_v18 = vld [vmem:[%s1254_s0 + $0x90] sm:$0xff]  ;;  %v27_v19 = vld [vmem:[%s1254_s0 + $0x98] sm:$0xff]  ;;  %v28_v20 = vld [vmem:[%s1254_s0 + $0xa0] sm:$0xff] }
  0x38   :  { %180 = vst [vmem:[%s1255_s1 + $0x90] sm:$0xff] %v26_v18  ;;  %181 = vst [vmem:[%s1255_s1 + $0x98] sm:$0xff] %v27_v19 }
  0x39   :  { %182 = vst [vmem:[%s1255_s1 + $0xa0] sm:$0xff] %v28_v20 }
  0x40   :  { %v29_v21 = vld [vmem:[%s1254_s0 + $0xa8] sm:$0xff]  ;;  %v30_v22 = vld [vmem:[%s1254_s0 + $0xb0] sm:$0xff]  ;;  %v31_v23 = vld [vmem:[%s1254_s0 + $0xb8] sm:$0xff] }
  0x41   :  { %183 = vst [vmem:[%s1255_s1 + $0xa8] sm:$0xff] %v29_v21  ;;  %184 = vst [vmem:[%s1255_s1 + $0xb0] sm:$0xff] %v30_v22 }
  0x42   :  { %185 = vst [vmem:[%s1255_s1 + $0xb8] sm:$0xff] %v31_v23 }
  0x49   :  { %v32_v24 = vld [vmem:[%s1254_s0 + $0xc0] sm:$0xff]  ;;  %v33_v25 = vld [vmem:[%s1254_s0 + $0xc8] sm:$0xff]  ;;  %v34_v26 = vld [vmem:[%s1254_s0 + $0xd0] sm:$0xff] }
  0x4a   :  { %186 = vst [vmem:[%s1255_s1 + $0xc0] sm:$0xff] %v32_v24  ;;  %187 = vst [vmem:[%s1255_s1 + $0xc8] sm:$0xff] %v33_v25 }
  0x4b   :  { %188 = vst [vmem:[%s1255_s1 + $0xd0] sm:$0xff] %v34_v26 }
  0x52   :  { %v35_v27 = vld [vmem:[%s1254_s0 + $0xd8] sm:$0xff]  ;;  %v36_v28 = vld [vmem:[%s1254_s0 + $0xe0] sm:$0xff]  ;;  %v37_v29 = vld [vmem:[%s1254_s0 + $0xe8] sm:$0xff] }
  0x53   :  { %189 = vst [vmem:[%s1255_s1 + $0xd8] sm:$0xff] %v35_v27  ;;  %190 = vst [vmem:[%s1255_s1 + $0xe0] sm:$0xff] %v36_v28 }
  0x54   :  { %191 = vst [vmem:[%s1255_s1 + $0xe8] sm:$0xff] %v37_v29 }
  0x5b   :  { %v38_v30 = vld [vmem:[%s1254_s0 + $0xf0] sm:$0xff]  ;;  %v39_v31 = vld [vmem:[%s1254_s0 + $0xf8] sm:$0xff]  ;;  %v40_v32 = vld [vmem:[%s1254_s0 + $0x100] sm:$0xff] }
  0x5c   :  { %192 = vst [vmem:[%s1255_s1 + $0xf0] sm:$0xff] %v38_v30  ;;  %193 = vst [vmem:[%s1255_s1 + $0xf8] sm:$0xff] %v39_v31 }
  0x5d   :  { %194 = vst [vmem:[%s1255_s1 + $0x100] sm:$0xff] %v40_v32 }
  0x64   :  { %v41_v33 = vld [vmem:[%s1254_s0 + $0x108] sm:$0xff]  ;;  %v42_v34 = vld [vmem:[%s1254_s0 + $0x110] sm:$0xff]  ;;  %v43_v35 = vld [vmem:[%s1254_s0 + $0x118] sm:$0xff] }
  0x65   :  { %195 = vst [vmem:[%s1255_s1 + $0x108] sm:$0xff] %v41_v33  ;;  %196 = vst [vmem:[%s1255_s1 + $0x110] sm:$0xff] %v42_v34 }
  0x66   :  { %197 = vst [vmem:[%s1255_s1 + $0x118] sm:$0xff] %v43_v35 }
  0x6d   :  { %v44_v36 = vld [vmem:[%s1254_s0 + $0x120] sm:$0xff]  ;;  %v45_v37 = vld [vmem:[%s1254_s0 + $0x128] sm:$0xff]  ;;  %v46_v38 = vld [vmem:[%s1254_s0 + $0x130] sm:$0xff] }
  0x6e   :  { %198 = vst [vmem:[%s1255_s1 + $0x120] sm:$0xff] %v44_v36  ;;  %199 = vst [vmem:[%s1255_s1 + $0x128] sm:$0xff] %v45_v37 }
  0x6f   :  { %200 = vst [vmem:[%s1255_s1 + $0x130] sm:$0xff] %v46_v38 }
  0x76   :  { %v47_v39 = vld [vmem:[%s1254_s0 + $0x138] sm:$0xff]  ;;  %v48_v40 = vld [vmem:[%s1254_s0 + $0x140] sm:$0xff]  ;;  %v49_v41 = vld [vmem:[%s1254_s0 + $0x148] sm:$0xff] }
  0x77   :  { %201 = vst [vmem:[%s1255_s1 + $0x138] sm:$0xff] %v47_v39  ;;  %202 = vst [vmem:[%s1255_s1 + $0x140] sm:$0xff] %v48_v40 }
  0x78   :  { %203 = vst [vmem:[%s1255_s1 + $0x148] sm:$0xff] %v49_v41 }
  0x7f   :  { %v50_v42 = vld [vmem:[%s1254_s0 + $0x150] sm:$0xff]  ;;  %v51_v43 = vld [vmem:[%s1254_s0 + $0x158] sm:$0xff]  ;;  %v52_v44 = vld [vmem:[%s1254_s0 + $0x160] sm:$0xff] }
  0x80   :  { %204 = vst [vmem:[%s1255_s1 + $0x150] sm:$0xff] %v50_v42  ;;  %205 = vst [vmem:[%s1255_s1 + $0x158] sm:$0xff] %v51_v43 }
  0x81   :  { %206 = vst [vmem:[%s1255_s1 + $0x160] sm:$0xff] %v52_v44 }
  0x88   :  { %v53_v45 = vld [vmem:[%s1254_s0 + $0x168] sm:$0xff]  ;;  %v54_v46 = vld [vmem:[%s1254_s0 + $0x170] sm:$0xff]  ;;  %v55_v47 = vld [vmem:[%s1254_s0 + $0x178] sm:$0xff] }
  0x89   :  { %207 = vst [vmem:[%s1255_s1 + $0x168] sm:$0xff] %v53_v45  ;;  %208 = vst [vmem:[%s1255_s1 + $0x170] sm:$0xff] %v54_v46 }
  0x8a   :  { %209 = vst [vmem:[%s1255_s1 + $0x178] sm:$0xff] %v55_v47 }
  0x91   :  { %v56_v48 = vld [vmem:[%s1254_s0 + $0x180] sm:$0xff]  ;;  %v57_v49 = vld [vmem:[%s1254_s0 + $0x188] sm:$0xff]  ;;  %v58_v50 = vld [vmem:[%s1254_s0 + $0x190] sm:$0xff] }
  0x92   :  { %210 = vst [vmem:[%s1255_s1 + $0x180] sm:$0xff] %v56_v48  ;;  %211 = vst [vmem:[%s1255_s1 + $0x188] sm:$0xff] %v57_v49 }
  0x93   :  { %212 = vst [vmem:[%s1255_s1 + $0x190] sm:$0xff] %v58_v50 }
  0x9a   :  { %v59_v51 = vld [vmem:[%s1254_s0 + $0x198] sm:$0xff]  ;;  %v60_v52 = vld [vmem:[%s1254_s0 + $0x1a0] sm:$0xff]  ;;  %v61_v53 = vld [vmem:[%s1254_s0 + $0x1a8] sm:$0xff] }
  0x9b   :  { %213 = vst [vmem:[%s1255_s1 + $0x198] sm:$0xff] %v59_v51  ;;  %214 = vst [vmem:[%s1255_s1 + $0x1a0] sm:$0xff] %v60_v52 }
  0x9c   :  { %215 = vst [vmem:[%s1255_s1 + $0x1a8] sm:$0xff] %v61_v53 }
  0xa3   :  { %v62_v54 = vld [vmem:[%s1254_s0 + $0x1b0] sm:$0xff]  ;;  %v63_v55 = vld [vmem:[%s1254_s0 + $0x1b8] sm:$0xff]  ;;  %v64_v56 = vld [vmem:[%s1254_s0 + $0x1c0] sm:$0xff] }
  0xa4   :  { %216 = vst [vmem:[%s1255_s1 + $0x1b0] sm:$0xff] %v62_v54  ;;  %217 = vst [vmem:[%s1255_s1 + $0x1b8] sm:$0xff] %v63_v55 }
  0xa5   :  { %218 = vst [vmem:[%s1255_s1 + $0x1c0] sm:$0xff] %v64_v56 }
  0xac   :  { %v65_v57 = vld [vmem:[%s1254_s0 + $0x1c8] sm:$0xff]  ;;  %v66_v58 = vld [vmem:[%s1254_s0 + $0x1d0] sm:$0xff]  ;;  %v67_v59 = vld [vmem:[%s1254_s0 + $0x1d8] sm:$0xff] }
  0xad   :  { %219 = vst [vmem:[%s1255_s1 + $0x1c8] sm:$0xff] %v65_v57  ;;  %220 = vst [vmem:[%s1255_s1 + $0x1d0] sm:$0xff] %v66_v58 }
  0xae   :  { %221 = vst [vmem:[%s1255_s1 + $0x1d8] sm:$0xff] %v67_v59 }
  0xb5   :  { %v68_v60 = vld [vmem:[%s1254_s0 + $0x1e0] sm:$0xff]  ;;  %v69_v61 = vld [vmem:[%s1254_s0 + $0x1e8] sm:$0xff]  ;;  %v70_v62 = vld [vmem:[%s1254_s0 + $0x1f0] sm:$0xff] }
  0xb6   :  { %222 = vst [vmem:[%s1255_s1 + $0x1e0] sm:$0xff] %v68_v60  ;;  %223 = vst [vmem:[%s1255_s1 + $0x1e8] sm:$0xff] %v69_v61 }
  0xb7   :  { %224 = vst [vmem:[%s1255_s1 + $0x1f0] sm:$0xff] %v70_v62 }
  0xbe   :  { %v71_v63 = vld [vmem:[%s1254_s0 + $0x1f8] sm:$0xff]  ;;  %v72_v0 = vld [vmem:[%s1254_s0 + $0x200] sm:$0xff]  ;;  %v73_v1 = vld [vmem:[%s1254_s0 + $0x208] sm:$0xff] }
  0xbf   :  { %225 = vst [vmem:[%s1255_s1 + $0x1f8] sm:$0xff] %v71_v63  ;;  %226 = vst [vmem:[%s1255_s1 + $0x200] sm:$0xff] %v72_v0 }
  0xc0   :  { %227 = vst [vmem:[%s1255_s1 + $0x208] sm:$0xff] %v73_v1 }
  0xc7   :  { %v74_v2 = vld [vmem:[%s1254_s0 + $0x210] sm:$0xff]  ;;  %v75_v3 = vld [vmem:[%s1254_s0 + $0x218] sm:$0xff]  ;;  %v76_v4 = vld [vmem:[%s1254_s0 + $0x220] sm:$0xff] }
  0xc8   :  { %228 = vst [vmem:[%s1255_s1 + $0x210] sm:$0xff] %v74_v2  ;;  %229 = vst [vmem:[%s1255_s1 + $0x218] sm:$0xff] %v75_v3 }
  0xc9   :  { %230 = vst [vmem:[%s1255_s1 + $0x220] sm:$0xff] %v76_v4 }
  0xd0   :  { %v77_v5 = vld [vmem:[%s1254_s0 + $0x228] sm:$0xff]  ;;  %v78_v6 = vld [vmem:[%s1254_s0 + $0x230] sm:$0xff]  ;;  %v79_v7 = vld [vmem:[%s1254_s0 + $0x238] sm:$0xff] }
  0xd1   :  { %231 = vst [vmem:[%s1255_s1 + $0x228] sm:$0xff] %v77_v5  ;;  %232 = vst [vmem:[%s1255_s1 + $0x230] sm:$0xff] %v78_v6 }
  0xd2   :  { %233 = vst [vmem:[%s1255_s1 + $0x238] sm:$0xff] %v79_v7 }
  0xd9   :  { %v80_v8 = vld [vmem:[%s1254_s0 + $0x240] sm:$0xff]  ;;  %v81_v9 = vld [vmem:[%s1254_s0 + $0x248] sm:$0xff]  ;;  %v82_v10 = vld [vmem:[%s1254_s0 + $0x250] sm:$0xff] }
  0xda   :  { %234 = vst [vmem:[%s1255_s1 + $0x240] sm:$0xff] %v80_v8  ;;  %235 = vst [vmem:[%s1255_s1 + $0x248] sm:$0xff] %v81_v9 }
  0xdb   :  { %236 = vst [vmem:[%s1255_s1 + $0x250] sm:$0xff] %v82_v10 }
  0xe2   :  { %v83_v11 = vld [vmem:[%s1254_s0 + $0x258] sm:$0xff]  ;;  %v84_v12 = vld [vmem:[%s1254_s0 + $0x260] sm:$0xff]  ;;  %v85_v13 = vld [vmem:[%s1254_s0 + $0x268] sm:$0xff] }
  0xe3   :  { %237 = vst [vmem:[%s1255_s1 + $0x258] sm:$0xff] %v83_v11  ;;  %238 = vst [vmem:[%s1255_s1 + $0x260] sm:$0xff] %v84_v12 }
  0xe4   :  { %239 = vst [vmem:[%s1255_s1 + $0x268] sm:$0xff] %v85_v13 }
  0xeb   :  { %v86_v14 = vld [vmem:[%s1254_s0 + $0x270] sm:$0xff]  ;;  %v87_v15 = vld [vmem:[%s1254_s0 + $0x278] sm:$0xff]  ;;  %v88_v16 = vld [vmem:[%s1254_s0 + $0x280] sm:$0xff] }
  0xec   :  { %240 = vst [vmem:[%s1255_s1 + $0x270] sm:$0xff] %v86_v14  ;;  %241 = vst [vmem:[%s1255_s1 + $0x278] sm:$0xff] %v87_v15 }
  0xed   :  { %242 = vst [vmem:[%s1255_s1 + $0x280] sm:$0xff] %v88_v16 }
  0xf4   :  { %v89_v17 = vld [vmem:[%s1254_s0 + $0x288] sm:$0xff]  ;;  %v90_v18 = vld [vmem:[%s1254_s0 + $0x290] sm:$0xff]  ;;  %v91_v19 = vld [vmem:[%s1254_s0 + $0x298] sm:$0xff] }
  0xf5   :  { %243 = vst [vmem:[%s1255_s1 + $0x288] sm:$0xff] %v89_v17  ;;  %244 = vst [vmem:[%s1255_s1 + $0x290] sm:$0xff] %v90_v18 }
  0xf6   :  { %245 = vst [vmem:[%s1255_s1 + $0x298] sm:$0xff] %v91_v19 }
  0xfd   :  { %v92_v20 = vld [vmem:[%s1254_s0 + $0x2a0] sm:$0xff]  ;;  %v93_v21 = vld [vmem:[%s1254_s0 + $0x2a8] sm:$0xff]  ;;  %v94_v22 = vld [vmem:[%s1254_s0 + $0x2b0] sm:$0xff] }
  0xfe   :  { %246 = vst [vmem:[%s1255_s1 + $0x2a0] sm:$0xff] %v92_v20  ;;  %247 = vst [vmem:[%s1255_s1 + $0x2a8] sm:$0xff] %v93_v21 }
  0xff   :  { %248 = vst [vmem:[%s1255_s1 + $0x2b0] sm:$0xff] %v94_v22 }
 0x106   :  { %v95_v23 = vld [vmem:[%s1254_s0 + $0x2b8] sm:$0xff]  ;;  %v96_v24 = vld [vmem:[%s1254_s0 + $0x2c0] sm:$0xff]  ;;  %v97_v25 = vld [vmem:[%s1254_s0 + $0x2c8] sm:$0xff] }
 0x107   :  { %249 = vst [vmem:[%s1255_s1 + $0x2b8] sm:$0xff] %v95_v23  ;;  %250 = vst [vmem:[%s1255_s1 + $0x2c0] sm:$0xff] %v96_v24 }
 0x108   :  { %251 = vst [vmem:[%s1255_s1 + $0x2c8] sm:$0xff] %v97_v25 }
 0x10f   :  { %v98_v26 = vld [vmem:[%s1254_s0 + $0x2d0] sm:$0xff]  ;;  %v99_v27 = vld [vmem:[%s1254_s0 + $0x2d8] sm:$0xff]  ;;  %v100_v28 = vld [vmem:[%s1254_s0 + $0x2e0] sm:$0xff] }
 0x110   :  { %252 = vst [vmem:[%s1255_s1 + $0x2d0] sm:$0xff] %v98_v26  ;;  %253 = vst [vmem:[%s1255_s1 + $0x2d8] sm:$0xff] %v99_v27 }
 0x111   :  { %254 = vst [vmem:[%s1255_s1 + $0x2e0] sm:$0xff] %v100_v28 }
 0x118   :  { %v101_v29 = vld [vmem:[%s1254_s0 + $0x2e8] sm:$0xff]  ;;  %v102_v30 = vld [vmem:[%s1254_s0 + $0x2f0] sm:$0xff]  ;;  %v103_v31 = vld [vmem:[%s1254_s0 + $0x2f8] sm:$0xff] }
 0x119   :  { %255 = vst [vmem:[%s1255_s1 + $0x2e8] sm:$0xff] %v101_v29  ;;  %256 = vst [vmem:[%s1255_s1 + $0x2f0] sm:$0xff] %v102_v30 }
 0x11a   :  { %257 = vst [vmem:[%s1255_s1 + $0x2f8] sm:$0xff] %v103_v31 }
 0x121   :  { %v104_v32 = vld [vmem:[%s1254_s0 + $0x300] sm:$0xff]  ;;  %v105_v33 = vld [vmem:[%s1254_s0 + $0x308] sm:$0xff]  ;;  %v106_v34 = vld [vmem:[%s1254_s0 + $0x310] sm:$0xff] }
 0x122   :  { %258 = vst [vmem:[%s1255_s1 + $0x300] sm:$0xff] %v104_v32  ;;  %259 = vst [vmem:[%s1255_s1 + $0x308] sm:$0xff] %v105_v33 }
 0x123   :  { %260 = vst [vmem:[%s1255_s1 + $0x310] sm:$0xff] %v106_v34 }
 0x12a   :  { %v107_v35 = vld [vmem:[%s1254_s0 + $0x318] sm:$0xff]  ;;  %v108_v36 = vld [vmem:[%s1254_s0 + $0x320] sm:$0xff]  ;;  %v109_v37 = vld [vmem:[%s1254_s0 + $0x328] sm:$0xff] }
 0x12b   :  { %261 = vst [vmem:[%s1255_s1 + $0x318] sm:$0xff] %v107_v35  ;;  %262 = vst [vmem:[%s1255_s1 + $0x320] sm:$0xff] %v108_v36 }
 0x12c   :  { %263 = vst [vmem:[%s1255_s1 + $0x328] sm:$0xff] %v109_v37 }
 0x133   :  { %v110_v38 = vld [vmem:[%s1254_s0 + $0x330] sm:$0xff]  ;;  %v111_v39 = vld [vmem:[%s1254_s0 + $0x338] sm:$0xff]  ;;  %v112_v40 = vld [vmem:[%s1254_s0 + $0x340] sm:$0xff] }
 0x134   :  { %264 = vst [vmem:[%s1255_s1 + $0x330] sm:$0xff] %v110_v38  ;;  %265 = vst [vmem:[%s1255_s1 + $0x338] sm:$0xff] %v111_v39 }
 0x135   :  { %266 = vst [vmem:[%s1255_s1 + $0x340] sm:$0xff] %v112_v40 }
 0x13c   :  { %v113_v41 = vld [vmem:[%s1254_s0 + $0x348] sm:$0xff]  ;;  %v114_v42 = vld [vmem:[%s1254_s0 + $0x350] sm:$0xff]  ;;  %v115_v43 = vld [vmem:[%s1254_s0 + $0x358] sm:$0xff] }
 0x13d   :  { %267 = vst [vmem:[%s1255_s1 + $0x348] sm:$0xff] %v113_v41  ;;  %268 = vst [vmem:[%s1255_s1 + $0x350] sm:$0xff] %v114_v42 }
 0x13e   :  { %269 = vst [vmem:[%s1255_s1 + $0x358] sm:$0xff] %v115_v43 }
 0x145   :  { %v116_v44 = vld [vmem:[%s1254_s0 + $0x360] sm:$0xff]  ;;  %v117_v45 = vld [vmem:[%s1254_s0 + $0x368] sm:$0xff]  ;;  %v118_v46 = vld [vmem:[%s1254_s0 + $0x370] sm:$0xff] }
 0x146   :  { %270 = vst [vmem:[%s1255_s1 + $0x360] sm:$0xff] %v116_v44  ;;  %271 = vst [vmem:[%s1255_s1 + $0x368] sm:$0xff] %v117_v45 }
 0x147   :  { %272 = vst [vmem:[%s1255_s1 + $0x370] sm:$0xff] %v118_v46 }
 0x14e   :  { %v119_v47 = vld [vmem:[%s1254_s0 + $0x378] sm:$0xff]  ;;  %v120_v48 = vld [vmem:[%s1254_s0 + $0x380] sm:$0xff]  ;;  %v121_v49 = vld [vmem:[%s1254_s0 + $0x388] sm:$0xff] }
 0x14f   :  { %273 = vst [vmem:[%s1255_s1 + $0x378] sm:$0xff] %v119_v47  ;;  %274 = vst [vmem:[%s1255_s1 + $0x380] sm:$0xff] %v120_v48 }
 0x150   :  { %275 = vst [vmem:[%s1255_s1 + $0x388] sm:$0xff] %v121_v49 }
 0x157   :  { %v122_v50 = vld [vmem:[%s1254_s0 + $0x390] sm:$0xff]  ;;  %v123_v51 = vld [vmem:[%s1254_s0 + $0x398] sm:$0xff]  ;;  %v124_v52 = vld [vmem:[%s1254_s0 + $0x3a0] sm:$0xff] }
 0x158   :  { %276 = vst [vmem:[%s1255_s1 + $0x390] sm:$0xff] %v122_v50  ;;  %277 = vst [vmem:[%s1255_s1 + $0x398] sm:$0xff] %v123_v51 }
 0x159   :  { %278 = vst [vmem:[%s1255_s1 + $0x3a0] sm:$0xff] %v124_v52 }
 0x160   :  { %v125_v53 = vld [vmem:[%s1254_s0 + $0x3a8] sm:$0xff]  ;;  %v126_v54 = vld [vmem:[%s1254_s0 + $0x3b0] sm:$0xff]  ;;  %v127_v55 = vld [vmem:[%s1254_s0 + $0x3b8] sm:$0xff] }
 0x161   :  { %279 = vst [vmem:[%s1255_s1 + $0x3a8] sm:$0xff] %v125_v53  ;;  %280 = vst [vmem:[%s1255_s1 + $0x3b0] sm:$0xff] %v126_v54 }
 0x162   :  { %281 = vst [vmem:[%s1255_s1 + $0x3b8] sm:$0xff] %v127_v55 }
 0x169   :  { %v128_v56 = vld [vmem:[%s1254_s0 + $0x3c0] sm:$0xff]  ;;  %v129_v57 = vld [vmem:[%s1254_s0 + $0x3c8] sm:$0xff]  ;;  %v130_v58 = vld [vmem:[%s1254_s0 + $0x3d0] sm:$0xff] }
 0x16a   :  { %282 = vst [vmem:[%s1255_s1 + $0x3c0] sm:$0xff] %v128_v56  ;;  %283 = vst [vmem:[%s1255_s1 + $0x3c8] sm:$0xff] %v129_v57 }
 0x16b   :  { %284 = vst [vmem:[%s1255_s1 + $0x3d0] sm:$0xff] %v130_v58 }
 0x172   :  { %v131_v59 = vld [vmem:[%s1254_s0 + $0x3d8] sm:$0xff]  ;;  %v132_v60 = vld [vmem:[%s1254_s0 + $0x3e0] sm:$0xff]  ;;  %v133_v61 = vld [vmem:[%s1254_s0 + $0x3e8] sm:$0xff] }
 0x173   :  { %285 = vst [vmem:[%s1255_s1 + $0x3d8] sm:$0xff] %v131_v59  ;;  %286 = vst [vmem:[%s1255_s1 + $0x3e0] sm:$0xff] %v132_v60 }
 0x174   :  { %287 = vst [vmem:[%s1255_s1 + $0x3e8] sm:$0xff] %v133_v61 }
 0x17b   :  { %v134_v62 = vld [vmem:[%s1254_s0 + $0x3f0] sm:$0xff]  ;;  %v135_v63 = vld [vmem:[%s1254_s0 + $0x3f8] sm:$0xff]  ;;  %v136_v0 = vld [vmem:[%s1254_s0 + $0x400] sm:$0xff] }
 0x17c   :  { %288 = vst [vmem:[%s1255_s1 + $0x3f0] sm:$0xff] %v134_v62  ;;  %289 = vst [vmem:[%s1255_s1 + $0x3f8] sm:$0xff] %v135_v63 }
 0x17d   :  { %290 = vst [vmem:[%s1255_s1 + $0x400] sm:$0xff] %v136_v0 }
 0x184   :  { %v137_v1 = vld [vmem:[%s1254_s0 + $0x408] sm:$0xff]  ;;  %v138_v2 = vld [vmem:[%s1254_s0 + $0x410] sm:$0xff]  ;;  %v139_v3 = vld [vmem:[%s1254_s0 + $0x418] sm:$0xff] }
 0x185   :  { %291 = vst [vmem:[%s1255_s1 + $0x408] sm:$0xff] %v137_v1  ;;  %292 = vst [vmem:[%s1255_s1 + $0x410] sm:$0xff] %v138_v2 }
 0x186   :  { %293 = vst [vmem:[%s1255_s1 + $0x418] sm:$0xff] %v139_v3 }
 0x18d   :  { %v140_v4 = vld [vmem:[%s1254_s0 + $0x420] sm:$0xff]  ;;  %v141_v5 = vld [vmem:[%s1254_s0 + $0x428] sm:$0xff]  ;;  %v142_v6 = vld [vmem:[%s1254_s0 + $0x430] sm:$0xff] }
 0x18e   :  { %294 = vst [vmem:[%s1255_s1 + $0x420] sm:$0xff] %v140_v4  ;;  %295 = vst [vmem:[%s1255_s1 + $0x428] sm:$0xff] %v141_v5 }
 0x18f   :  { %296 = vst [vmem:[%s1255_s1 + $0x430] sm:$0xff] %v142_v6 }
 0x196   :  { %v143_v7 = vld [vmem:[%s1254_s0 + $0x438] sm:$0xff]  ;;  %v144_v8 = vld [vmem:[%s1254_s0 + $0x440] sm:$0xff]  ;;  %v145_v9 = vld [vmem:[%s1254_s0 + $0x448] sm:$0xff] }
 0x197   :  { %297 = vst [vmem:[%s1255_s1 + $0x438] sm:$0xff] %v143_v7  ;;  %298 = vst [vmem:[%s1255_s1 + $0x440] sm:$0xff] %v144_v8 }
 0x198   :  { %299 = vst [vmem:[%s1255_s1 + $0x448] sm:$0xff] %v145_v9 }
 0x19f   :  { %v146_v10 = vld [vmem:[%s1254_s0 + $0x450] sm:$0xff]  ;;  %v147_v11 = vld [vmem:[%s1254_s0 + $0x458] sm:$0xff]  ;;  %v148_v12 = vld [vmem:[%s1254_s0 + $0x460] sm:$0xff] }
 0x1a0   :  { %300 = vst [vmem:[%s1255_s1 + $0x450] sm:$0xff] %v146_v10  ;;  %301 = vst [vmem:[%s1255_s1 + $0x458] sm:$0xff] %v147_v11 }
 0x1a1   :  { %302 = vst [vmem:[%s1255_s1 + $0x460] sm:$0xff] %v148_v12 }
 0x1a8   :  { %v149_v13 = vld [vmem:[%s1254_s0 + $0x468] sm:$0xff]  ;;  %v150_v14 = vld [vmem:[%s1254_s0 + $0x470] sm:$0xff]  ;;  %v151_v15 = vld [vmem:[%s1254_s0 + $0x478] sm:$0xff] }
 0x1a9   :  { %303 = vst [vmem:[%s1255_s1 + $0x468] sm:$0xff] %v149_v13  ;;  %304 = vst [vmem:[%s1255_s1 + $0x470] sm:$0xff] %v150_v14 }
 0x1aa   :  { %305 = vst [vmem:[%s1255_s1 + $0x478] sm:$0xff] %v151_v15 }
 0x1b1   :  { %v152_v16 = vld [vmem:[%s1254_s0 + $0x480] sm:$0xff]  ;;  %v153_v17 = vld [vmem:[%s1254_s0 + $0x488] sm:$0xff]  ;;  %v154_v18 = vld [vmem:[%s1254_s0 + $0x490] sm:$0xff] }
 0x1b2   :  { %306 = vst [vmem:[%s1255_s1 + $0x480] sm:$0xff] %v152_v16  ;;  %307 = vst [vmem:[%s1255_s1 + $0x488] sm:$0xff] %v153_v17 }
 0x1b3   :  { %308 = vst [vmem:[%s1255_s1 + $0x490] sm:$0xff] %v154_v18 }
 0x1ba   :  { %v155_v19 = vld [vmem:[%s1254_s0 + $0x498] sm:$0xff]  ;;  %v156_v20 = vld [vmem:[%s1254_s0 + $0x4a0] sm:$0xff]  ;;  %v157_v21 = vld [vmem:[%s1254_s0 + $0x4a8] sm:$0xff] }
 0x1bb   :  { %309 = vst [vmem:[%s1255_s1 + $0x498] sm:$0xff] %v155_v19  ;;  %310 = vst [vmem:[%s1255_s1 + $0x4a0] sm:$0xff] %v156_v20 }
 0x1bc   :  { %311 = vst [vmem:[%s1255_s1 + $0x4a8] sm:$0xff] %v157_v21 }
 0x1c3   :  { %v158_v22 = vld [vmem:[%s1254_s0 + $0x4b0] sm:$0xff]  ;;  %v159_v23 = vld [vmem:[%s1254_s0 + $0x4b8] sm:$0xff]  ;;  %v160_v24 = vld [vmem:[%s1254_s0 + $0x4c0] sm:$0xff] }
 0x1c4   :  { %312 = vst [vmem:[%s1255_s1 + $0x4b0] sm:$0xff] %v158_v22  ;;  %313 = vst [vmem:[%s1255_s1 + $0x4b8] sm:$0xff] %v159_v23 }
 0x1c5   :  { %314 = vst [vmem:[%s1255_s1 + $0x4c0] sm:$0xff] %v160_v24 }
 0x1cc   :  { %v161_v25 = vld [vmem:[%s1254_s0 + $0x4c8] sm:$0x1] }
 0x1cd   :  { %315 = vst [vmem:[%s1255_s1 + $0x4c8] sm:$0x1] %v161_v25 }

</bundles_post_ra>
